<compile_context>
chip_gen: v7x
topology: tpu7x:2x2x1
jax: 0.10.0
libtpu: 0.0.40
codegen_flags: <defaults>
</compile_context>

<pallas_src>
import functools
import math

import jax
import jax.numpy as jnp
from jax.experimental import pallas as pl
from jax.experimental.pallas import tpu as pltpu

LANES = 128


def _pow_small_int(x, gamma):
    """Compile-time specialization of x**gamma for small integer gamma."""
    if float(gamma).is_integer() and 0 <= int(gamma) <= 8:
        g = int(gamma)
        if g == 0:
            return jnp.ones_like(x)
        y = x
        for _ in range(g - 1):
            y = y * x
        return y
    return x ** gamma  # falls back to EUP exp(gamma*log(x))


def _focal_kernel(pred_ref, target_ref, out_ref, *, alpha, gamma, tm):
    x = pred_ref[...].astype(jnp.float32)
    t = target_ref[...].astype(jnp.float32)

    p = jax.nn.sigmoid(x)
    pt = t * p + (1.0 - t) * (1.0 - p)
    focal_weight = alpha * _pow_small_int(1.0 - pt, gamma)
    loss = -focal_weight * jnp.log(pt + 1e-06)

    # Reduce the (tm, 128) tile to an (8, 128) partial-sum vreg block.
    # reshape (tm,128) -> (tm//8, 8, 128) does not cross (8,128) tile
    # boundaries; the axis-0 sum is plain elementwise vreg adds (VALU).
    out_ref[...] = jnp.sum(loss.reshape(tm // 8, 8, LANES), axis=0)


def focal_loss(pred, target, alpha=0.7, gamma=2.0, tm=1024):
    """Mean sigmoid focal loss over all elements. pred/target: same shape."""
    assert pred.shape == target.shape
    n_valid = math.prod(pred.shape)

    # Flatten to [rows, 128]; keep native dtype (cast happens in-kernel).
    rows = pl.cdiv(n_valid, LANES)
    rows8 = pl.cdiv(rows, 8) * 8                # rows rounded up to sublane mult
    tm_eff = min(tm, rows8)                     # shrink tile for tiny inputs
    padded_rows = pl.cdiv(rows8, tm_eff) * tm_eff
    pad_elems = padded_rows * LANES - n_valid

    pred_flat = pred.reshape(-1)
    target_flat = target.reshape(-1)
    if pad_elems > 0:
        # Pad tail with values that yield an exactly-zero loss:
        # sigmoid(-30) ~ 9e-14 -> pt rounds to 1.0 in f32 -> focal_weight = 0.
        pred_flat = jnp.concatenate(
            [pred_flat, jnp.full((pad_elems,), -30.0, dtype=pred_flat.dtype)])
        target_flat = jnp.concatenate(
            [target_flat, jnp.zeros((pad_elems,), dtype=target_flat.dtype)])

    pred2d = pred_flat.reshape(padded_rows, LANES)
    target2d = target_flat.reshape(padded_rows, LANES)

    num_blocks = padded_rows // tm_eff
    kernel = functools.partial(
        _focal_kernel, alpha=float(alpha), gamma=float(gamma), tm=tm_eff)

    partials = pl.pallas_call(
        kernel,
        out_shape=jax.ShapeDtypeStruct((num_blocks * 8, LANES), jnp.float32),
        grid_spec=pltpu.PrefetchScalarGridSpec(
            num_scalar_prefetch=0,
            grid=(num_blocks,),
            in_specs=[
                pl.BlockSpec((tm_eff, LANES), lambda i: (i, 0)),
                pl.BlockSpec((tm_eff, LANES), lambda i: (i, 0)),
            ],
            out_specs=pl.BlockSpec((8, LANES), lambda i: (i, 0)),
        ),
        compiler_params=pltpu.CompilerParams(
            dimension_semantics=("parallel",)),
    )(pred2d, target2d)

    # Tiny final reduction + mean in JAX (divide by the TRUE element count).
    return jnp.sum(partials) / jnp.float32(n_valid)


def focal_loss_ref(pred, target, alpha=0.7, gamma=2.0):
    p = jax.nn.sigmoid(pred.astype(jnp.float32))
    t = target.astype(jnp.float32)
    pt = t * p + (1 - t) * (1 - p)
    fw = alpha * (1 - pt) ** gamma
    loss = -fw * jnp.log(pt + 1e-06)
    return jnp.mean(loss)


if __name__ == "__main__":
    key = jax.random.PRNGKey(0)
    k1, k2 = jax.random.split(key)
    # NCHW, consistent with a UNet segmentation head: logits + binary targets.
    pred = jax.random.normal(k1, (2, 4, 16, 16), dtype=jnp.float32)
    target = (jax.random.uniform(k2, (2, 4, 16, 16)) > 0.5).astype(jnp.float32)

    out = jax.block_until_ready(focal_loss(pred, target))
    ref = jax.block_until_ready(focal_loss_ref(pred, target))

    assert jnp.allclose(out, ref, rtol=1e-5, atol=1e-6), (out, ref)
    print("KERNEL_OK")
</pallas_src>

<mosaic_0001>
module attributes {stable_mosaic.version = 11 : i64} {
  func.func @_focal_kernel(%arg0: i32, %arg1: memref<16x128xf32, #tpu.memory_space<vmem>>, %arg2: memref<16x128xf32, #tpu.memory_space<vmem>>, %arg3: memref<8x128xf32, #tpu.memory_space<vmem>>) attributes {dimension_semantics = [#tpu.dimension_semantics<parallel>], iteration_bounds = array<i64: 1>, scalar_prefetch = 0 : i64, scratch_operands = 0 : i64, tpu.core_type = #tpu.core_type<tc>, window_params = [{transform_indices = @transform_0, window_bounds = array<i64: 16, 128>}, {transform_indices = @transform_1, window_bounds = array<i64: 16, 128>}, {transform_indices = @transform_2, window_bounds = array<i64: 8, 128>}]} {
    %c0 = arith.constant 0 : index
    %c0_0 = arith.constant 0 : index
    %0 = vector.load %arg1[%c0, %c0_0] : memref<16x128xf32, #tpu.memory_space<vmem>>, vector<16x128xf32>
    %c0_1 = arith.constant 0 : index
    %c0_2 = arith.constant 0 : index
    %1 = vector.load %arg2[%c0_1, %c0_2] : memref<16x128xf32, #tpu.memory_space<vmem>>, vector<16x128xf32>
    %2 = arith.negf %0 : vector<16x128xf32>
    %3 = math.exp %2 : vector<16x128xf32>
    %cst = arith.constant 1.000000e+00 : f32
    %4 = vector.broadcast %cst : f32 to vector<16x128xf32>
    %5 = arith.addf %4, %3 : vector<16x128xf32>
    %6 = arith.divf %4, %5 : vector<16x128xf32>
    %7 = arith.mulf %1, %6 : vector<16x128xf32>
    %cst_3 = arith.constant 1.000000e+00 : f32
    %8 = vector.broadcast %cst_3 : f32 to vector<16x128xf32>
    %9 = arith.subf %8, %1 : vector<16x128xf32>
    %cst_4 = arith.constant 1.000000e+00 : f32
    %10 = vector.broadcast %cst_4 : f32 to vector<16x128xf32>
    %11 = arith.subf %10, %6 : vector<16x128xf32>
    %12 = arith.mulf %9, %11 : vector<16x128xf32>
    %13 = arith.addf %7, %12 : vector<16x128xf32>
    %cst_5 = arith.constant 1.000000e+00 : f32
    %14 = vector.broadcast %cst_5 : f32 to vector<16x128xf32>
    %15 = arith.subf %14, %13 : vector<16x128xf32>
    %16 = arith.mulf %15, %15 : vector<16x128xf32>
    %cst_6 = arith.constant 0.699999988 : f32
    %17 = vector.broadcast %cst_6 : f32 to vector<16x128xf32>
    %18 = arith.mulf %17, %16 : vector<16x128xf32>
    %cst_7 = arith.constant 0.000000e+00 : f32
    %19 = vector.broadcast %cst_7 : f32 to vector<16x128xf32>
    %20 = arith.subf %19, %18 : vector<16x128xf32>
    %cst_8 = arith.constant 9.99999997E-7 : f32
    %21 = vector.broadcast %cst_8 : f32 to vector<16x128xf32>
    %22 = arith.addf %13, %21 : vector<16x128xf32>
    %23 = math.log %22 : vector<16x128xf32>
    %24 = arith.mulf %20, %23 : vector<16x128xf32>
    %25 = vector.shape_cast %24 : vector<16x128xf32> to vector<2x8x128xf32>
    %cst_9 = arith.constant dense<0.000000e+00> : vector<8x128xf32>
    %26 = vector.multi_reduction <add>, %25, %cst_9 [0] : vector<2x8x128xf32> to vector<8x128xf32>
    %c0_10 = arith.constant 0 : index
    %c0_11 = arith.constant 0 : index
    %27 = vector.load %arg3[%c0_10, %c0_11] : memref<8x128xf32, #tpu.memory_space<vmem>>, vector<8x128xf32>
    tpu.vector_store %arg3[%c0_10, %c0_11], %26 {strides = array<i32>} : memref<8x128xf32, #tpu.memory_space<vmem>>, vector<8x128xf32>,
    return
  }
  func.func @transform_0(%arg0: i32) -> (i32, i32) {
    %c0_i32 = arith.constant 0 : i32
    %c0_i32_0 = arith.constant 0 : i32
    return %arg0, %c0_i32 : i32, i32
  }
  func.func @transform_1(%arg0: i32) -> (i32, i32) {
    %c0_i32 = arith.constant 0 : i32
    %c0_i32_0 = arith.constant 0 : i32
    return %arg0, %c0_i32 : i32, i32
  }
  func.func @transform_2(%arg0: i32) -> (i32, i32) {
    %c0_i32 = arith.constant 0 : i32
    %c0_i32_0 = arith.constant 0 : i32
    return %arg0, %c0_i32 : i32, i32
  }
}

</mosaic_0001>

<bundles_post_ra>
// kernel: tpu_custom_call.1
= control target key start
LH: loop header
LB: loop body
LE: loop exit
PB: predicated region body
PF: predicated region fallthrough
CT: control target
= control target key end

     0   :  { %7 = vsyncpa [#allocation3], 0  ;;  %s247_s0 = inlined_call_operand.hbm [shape: f32[16,128], index: 0, kind: input, shape index: {}]   ;;  %s248_s1 = inlined_call_operand.hbm [shape: f32[16,128], index: 1, kind: input, shape index: {}]   ;;  %s249_s2 = inlined_call_operand.hbm [shape: f32[8,128], index: 2, kind: output, shape index: {}]  }
   0x1   :  { %8 = vsyncpa [#allocation6], 0 }
   0x2   :  { %9 = vsyncpa [#allocation4], 0  ;;  %s191_s9 = smov [#allocation2]   ;;  %s119_s13 = scalar_lea.hbm %s247_s0, 256 }
   0x3   :  { %s15_s10 = sshll.u32 %s191_s9, 4  ;;  %p120_p0 = scmp.ne.s32.totalorder %s247_s0, %s119_s13  ;;  %s16_s10 = int_to_ptr.vmem [resolvable:$true] %s15_s10 }
   0x4   :  { %p123_p1 = scmp.lt.u32.totalorder %s119_s13, %s247_s0 }
   0x6   :  { %p125_p2 = pnand %p123_p1, %p120_p0 }
   0x8   :  { %128 = shalt.err (!%p125_p2)
}
   0x9   :  { %s129_s18 = scalar_lea.vmem %s16_s10, 256  ;;  %p134_p4 = scmp.lt.s32.totalorder %s16_s10, %s16_s10 }
   0xa   :  { %p130_p3 = scmp.ne.s32.totalorder %s16_s10, %s129_s18  ;;  %p135_p5 = scmp.lt.s32.totalorder %s129_s18, %s129_s18 }
   0xc   :  { %p136_p6 = por %p135_p5, %p134_p4 }
   0xe   :  { %p137_p7 = pnand %p136_p6, %p130_p3 }
  0x10   :  { %140 = shalt.err (!%p137_p7)
}
  0x11   :  { %s192_s19 = smov 128   ;;  %s193_s20 = smov 8  }
  0x12   :  { %21 = dma.hbm_to_vmem [thread:$0]  %s247_s0, 256, %s16_s10, [#allocation3], %s192_s19, %s192_s19, %s193_s20  }
  0x13   :  { %s194_s23 = smov [#allocation5]   ;;  %s141_s27 = scalar_lea.hbm %s248_s1, 256 }
  0x14   :  { %s27_s24 = sshll.u32 %s194_s23, 4  ;;  %p142_p8 = scmp.ne.s32.totalorder %s248_s1, %s141_s27  ;;  %s28_s24 = int_to_ptr.vmem [resolvable:$true] %s27_s24 }
  0x15   :  { %p145_p9 = scmp.lt.u32.totalorder %s141_s27, %s248_s1 }
  0x17   :  { %p147_p10 = pnand %p145_p9, %p142_p8 }
  0x19   :  { %150 = shalt.err (!%p147_p10)
}
  0x1a   :  { %s151_s4 = scalar_lea.vmem %s28_s24, 256  ;;  %p156_p12 = scmp.lt.s32.totalorder %s28_s24, %s28_s24 }
  0x1b   :  { %p152_p11 = scmp.ne.s32.totalorder %s28_s24, %s151_s4  ;;  %p157_p13 = scmp.lt.s32.totalorder %s151_s4, %s151_s4 }
  0x1d   :  { %p158_p0 = por %p157_p13, %p156_p12 }
  0x1f   :  { %p159_p1 = pnand %p158_p0, %p152_p11 }
  0x21   :  { %162 = shalt.err (!%p159_p1)
}
  0x22   :  { %33 = dma.hbm_to_vmem [thread:$0]  %s248_s1, 256, %s28_s24, [#allocation6], %s192_s19, %s192_s19, %s193_s20  }
  0x23   :  { %185 = dma.done.wait [#allocation3], 256  }
  0x24   :  { %186 = vsyncadd [#allocation3], 4294967040 }
  0x25   :  { %187 = dma.done.wait [#allocation6], 256  }
  0x26   :  { %188 = vsyncadd [#allocation6], 4294967040  ;;  %v40_v0 = vld [vmem:[#allocation2] sm:$0xff]  ;;  %v41_v1 = vld [vmem:[#allocation2 + $0x8] sm:$0xff]  ;;  %s195_s1 = smov [#allocation7]  }
  0x27   :  { %v100_v2 = vmul.f32 -1.442695, %v40_v0  ;;  %v101_v3 = vmul.f32 -1.442695, %v41_v1  ;;  %v42_v8 = vld [vmem:[#allocation5] sm:$0xff]  ;;  %v43_v9 = vld [vmem:[#allocation5 + $0x8] sm:$0xff] }
  0x28   :  { %v58_v10 = vsub.f32 1.0, %v42_v8  ;;  %v59_v12 = vsub.f32 1.0, %v43_v9  ;;  %s90_s6 = sshll.u32 %s195_s1, 4  ;;  %s91_s6 = int_to_ptr.vmem [resolvable:$true] %s90_s6 }
  0x29   :  { %107 = vpow2.f32 %v100_v2  ;;  %s163_s7 = scalar_lea.vmem %s91_s6, 128  ;;  %p168_p3 = scmp.lt.s32.totalorder %s91_s6, %s91_s6 }
  0x2a   :  { %109 = vpow2.f32 %v101_v3  ;;  %p164_p2 = scmp.ne.s32.totalorder %s91_s6, %s163_s7  ;;  %p169_p4 = scmp.lt.s32.totalorder %s163_s7, %s163_s7 }
  0x2c   :  { %p170_p5 = por %p169_p4, %p168_p3 }
  0x2e   :  { %p171_p6 = pnand %p170_p5, %p164_p2 }
  0x33   :  { %v108_v4 = vpop.eup %107 }
  0x34   :  { %v110_v5 = vpop.eup %109  ;;  %v50_v6 = vadd.f32 1.0, %v108_v4 }
  0x35   :  { %v51_v7 = vadd.f32 1.0, %v110_v5 }
  0x36   :  { %111 = vrcp.f32 %v50_v6 }
  0x37   :  { %113 = vrcp.f32 %v51_v7 }
  0x40   :  { %v112_v11 = vpop.eup %111 }
  0x41   :  { %v114_v13 = vpop.eup %113  ;;  %v56_v14 = vmul.f32 %v112_v11, %v42_v8  ;;  %v60_v15 = vsub.f32 1.0, %v112_v11 }
  0x42   :  { %v57_v16 = vmul.f32 %v114_v13, %v43_v9  ;;  %v61_v17 = vsub.f32 1.0, %v114_v13 }
  0x43   :  { %v62_v18 = vmul.f32 %v60_v15, %v58_v10 }
  0x44   :  { %v63_v19 = vmul.f32 %v61_v17, %v59_v12 }
  0x45   :  { %v64_v20 = vadd.f32 %v62_v18, %v56_v14 }
  0x46   :  { %v65_v21 = vadd.f32 %v63_v19, %v57_v16 }
  0x47   :  { %v66_v22 = vsub.f32 1.0, %v64_v20  ;;  %v74_v23 = vadd.f32 1e-06, %v64_v20 }
  0x48   :  { %v67_v24 = vsub.f32 1.0, %v65_v21  ;;  %v75_v25 = vadd.f32 1e-06, %v65_v21 }
  0x49   :  { %115 = vlog2.f32 %v74_v23  ;;  %v68_v26 = vmul.f32 %v66_v22, %v66_v22 }
  0x4a   :  { %117 = vlog2.f32 %v75_v25  ;;  %v69_v27 = vmul.f32 %v67_v24, %v67_v24 }
  0x4b   :  { %v70_v28 = vmul.f32 0.7, %v68_v26 }
  0x4c   :  { %v71_v29 = vmul.f32 0.7, %v69_v27 }
  0x4d   :  { %v72_v30 = vsub.f32 0.0, %v70_v28 }
  0x4e   :  { %v73_v32 = vsub.f32 0.0, %v71_v29 }
  0x53   :  { %v116_v31 = vpop.eup %115 }
  0x54   :  { %v118_v33 = vpop.eup %117  ;;  %v77_v34 = vmul.f32 0.6931472, %v116_v31 }
  0x55   :  { %v79_v35 = vmul.f32 0.6931472, %v118_v33 }
  0x56   :  { %v80_v36 = vmul.f32 %v77_v34, %v72_v30 }
  0x57   :  { %v81_v37 = vmul.f32 %v79_v35, %v73_v32 }
  0x59   :  { %v82_v38 = vadd.f32 %v81_v37, %v80_v36 }
  0x5b   :  { %83 = vst [vmem:[#allocation7] sm:$0xff] %v82_v38 }
  0x5c   :  { %174 = shalt.err (!%p171_p6)
}
  0x5d   :  { %s175_s10 = scalar_lea.hbm %s249_s2, 128 }
  0x5e   :  { %p176_p7 = scmp.ne.s32.totalorder %s249_s2, %s175_s10  ;;  %p179_p8 = scmp.lt.u32.totalorder %s175_s10, %s249_s2 }
  0x60   :  { %p181_p9 = pnand %p179_p8, %p176_p7 }
  0x62   :  { %184 = shalt.err (!%p181_p9)
}
  0x63   :  { %93 = dma.vmem_to_hbm [thread:$0]  %s91_s6, 128, %s249_s2, [#allocation4]  }
  0x64   :  { %189 = dma.done.wait [#allocation4], 128  }
  0x65   :  { %190 = vsyncadd [#allocation4], 4294967168 }
  0x66   :  { %97 = vsyncpa [#allocation3], 1 }
  0x67   :  { %98 = vsyncpa [#allocation6], 1 }
  0x68   :  { %99 = vsyncpa [#allocation4], 1 }

</bundles_post_ra>
